<compile_context>
chip_gen: v6e
topology: v6e:2x2x1
jax: 0.10.0
libtpu: 0.0.40
codegen_flags: <defaults>
</compile_context>

<pallas_src>
import functools

import jax
import jax.numpy as jnp
from jax.experimental import pallas as pl
from jax.experimental.pallas import tpu as pltpu


# ----------------------------------------------------------------------------
# Fused Pallas kernel: all residual layers for one batch element.
#   per layer l (dilation d):
#     xs[t]            = x[t-d]  (zeros for t < d)
#     fg               = [xs|x] @ Wfg_l + bfg_l        (fused k=2 causal conv)
#     g                = tanh(fg[:, :C]) * sigmoid(fg[:, C:])
#     [fx_res | skip]  = g @ Wrs_l + brs_l             (fused 1x1 res+skip)
#     x                = fx_res + x                    (residual, f32)
# ----------------------------------------------------------------------------
def _dilated_stack_kernel(x_ref, wfg_ref, bfg_ref, wrs_ref, brs_ref,
                          skip_ref, res_ref, skip_acc,
                          *, dilations, channels, skip_size, compute_dtype):
    T = x_ref.shape[1]
    C = channels
    S = skip_size

    # Residual chain kept in f32 (required for full VPU/EUP rate on v5e and
    # for accuracy of the long residual sum); only MXU operands get cast.
    x = x_ref[0].astype(jnp.float32)                          # (T, C)
    t_iota = jax.lax.broadcasted_iota(jnp.int32, (T, C), 0)

    for l, d in enumerate(dilations):                         # static unroll
        # Causal shift within this batch element: xs[t] = x[t-d], 0 for t < d.
        # Static-shift XLU rotate (free slot) + VPU mask.
        xs = pltpu.roll(x, shift=d % T, axis=0)
        xs = jnp.where(t_iota < d, 0.0, xs)

        # Cast BEFORE the lane-concat so the (T, 2C) operand is built once in
        # compute_dtype; one (T,2C)x(2C,2C) MXU op instead of four (T,C)x(C,C).
        xcat = jnp.concatenate(
            [xs.astype(compute_dtype), x.astype(compute_dtype)], axis=1)
        fg = jnp.dot(xcat, wfg_ref[l],
                     preferred_element_type=jnp.float32) + bfg_ref[l]
        g = jnp.tanh(fg[:, :C]) * jax.nn.sigmoid(fg[:, C:])   # f32 EUP math

        # Fused residual+skip 1x1 convs: one (T,C)x(C,C+S) matmul.
        rs = jnp.dot(g.astype(compute_dtype), wrs_ref[l],
                     preferred_element_type=jnp.float32) + brs_ref[l]

        # Park this layer's skip in the VMEM slab (bounds live ranges to one
        # layer instead of keeping all L skip tiles live until a final concat).
        skip_acc[:, l * S:(l + 1) * S] = rs[:, C:]
        x = rs[:, :C] + x                                     # residual (f32)

    # Single lane-dense store of the packed skip slab + final residual.
    skip_ref[0] = skip_acc[...].astype(skip_ref.dtype)
    res_ref[0] = x.astype(res_ref.dtype)


# ----------------------------------------------------------------------------
# One-time weight preparation (transpose / fuse / stack / cast).
# ----------------------------------------------------------------------------
def prepare_params(torch_params, compute_dtype=jnp.float32):
    """Stack & fuse the per-layer PyTorch-layout weights once.

    torch_params: list of dicts (PyTorch Conv1d layouts):
      wf, wg: (C, C, 2)  bf, bg: (C,)   causal conv k=2 (tap0 -> x[t-d], tap1 -> x[t])
      wr:     (C, C, 1)  br:     (C,)   1x1 residual conv
      ws:     (S, C, 1)  bs:     (S,)   1x1 skip conv
      dilation: int
    """
    wfg, bfg, wrs, brs, dilations = [], [], [], [], []
    for p in torch_params:
        dilations.append(int(p["dilation"]))

        # Fused causal-conv weight: rows [0:C] act on x_shift, rows [C:2C] on x;
        # cols [0:C] -> filter, cols [C:2C] -> gate.
        wf0, wf1 = p["wf"][:, :, 0].T, p["wf"][:, :, 1].T       # (C, C)
        wg0, wg1 = p["wg"][:, :, 0].T, p["wg"][:, :, 1].T
        wfg.append(jnp.concatenate(
            [jnp.concatenate([wf0, wg0], axis=1),
             jnp.concatenate([wf1, wg1], axis=1)], axis=0))     # (2C, 2C)
        bfg.append(jnp.concatenate([p["bf"], p["bg"]])[None, :])

        # Algebraic fusion of residual (Wr) and skip (Ws) 1x1 convs:
        #   fx_res = g @ A + br ;  skip = fx_res @ B + bs
        #   => [fx_res | skip] = g @ [A | A@B] + [br | br@B + bs]
        A = p["wr"][:, :, 0].T.astype(jnp.float32)              # (C, C)
        Bs = p["ws"][:, :, 0].T.astype(jnp.float32)             # (C, S)
        wrs.append(jnp.concatenate([A, A @ Bs], axis=1))        # (C, C+S)
        brs.append(jnp.concatenate(
            [p["br"].astype(jnp.float32),
             p["br"].astype(jnp.float32) @ Bs + p["bs"].astype(jnp.float32)]
        )[None, :])                                             # (1, C+S)

    return {
        "wfg": jnp.stack(wfg).astype(compute_dtype),   # (L, 2C, 2C)
        "bfg": jnp.stack(bfg).astype(jnp.float32),     # (L, 1, 2C)
        "wrs": jnp.stack(wrs).astype(compute_dtype),   # (L, C, C+S)
        "brs": jnp.stack(brs).astype(jnp.float32),     # (L, 1, C+S)
        "dilations": tuple(dilations),
        "compute_dtype": compute_dtype,
    }


# ----------------------------------------------------------------------------
# PyTorch-facing wrapper.  x_nct: (B, C, T) like nn.Conv1d expects.
# Returns (skips (L, B, skip_size, T), residual (B, C, T)) like
# DilatedStack.forward.
# ----------------------------------------------------------------------------
def dilated_stack_pallas(x_nct, prepped):
    B, C, T = x_nct.shape
    wfg, bfg = prepped["wfg"], prepped["bfg"]
    wrs, brs = prepped["wrs"], prepped["brs"]
    dilations = prepped["dilations"]
    compute_dtype = prepped["compute_dtype"]
    L = wfg.shape[0]
    S = wrs.shape[2] - C

    x_btc = jnp.transpose(x_nct, (0, 2, 1))      # (B, T, C): channels on lanes

    kernel = functools.partial(_dilated_stack_kernel, dilations=dilations,
                               channels=C, skip_size=S,
                               compute_dtype=compute_dtype)

    def full_spec(arr):
        zeros = (0,) * arr.ndim
        # NOTE: constant index_map -> fetched once; pl.Buffered(1) could
        # reclaim the second buffer's VMEM at large L/C (left at default here).
        return pl.BlockSpec(arr.shape, lambda b, z=zeros: z)

    # Generation-aware VMEM budget (64 MiB/TC on v7x, 128 MiB on v5e/v6e),
    # with ~25% headroom, floored at 32 MiB.
    try:
        vmem_cap = int(getattr(pltpu.get_tpu_info(), "vmem_capacity_bytes",
                               64 << 20))
    except Exception:  # pragma: no cover - defensive fallback
        vmem_cap = 64 << 20
    w_bytes = sum(int(a.size) * a.dtype.itemsize for a in (wfg, bfg, wrs, brs))
    blk_bytes = 4 * T * (2 * C + L * S)          # x / res / skip blocks (f32)
    scratch_bytes = 4 * T * L * S                # skip slab
    interm_bytes = 4 * T * (4 * C + 2 * S)       # per-layer live intermediates
    need = 2 * (w_bytes + blk_bytes) + scratch_bytes + interm_bytes + (8 << 20)
    vmem_limit = int(min(max(need, 32 << 20), int(vmem_cap * 3 // 4)))

    skip_flat, res_btc = pl.pallas_call(
        kernel,
        grid=(B,),                                # >=2 steps -> v7x 2-TC split
        in_specs=[pl.BlockSpec((1, T, C), lambda b: (b, 0, 0)),
                  full_spec(wfg), full_spec(bfg),
                  full_spec(wrs), full_spec(brs)],
        out_specs=(pl.BlockSpec((1, T, L * S), lambda b: (b, 0, 0)),
                   pl.BlockSpec((1, T, C), lambda b: (b, 0, 0))),
        out_shape=(jax.ShapeDtypeStruct((B, T, L * S), x_nct.dtype),
                   jax.ShapeDtypeStruct((B, T, C), x_nct.dtype)),
        scratch_shapes=[pltpu.VMEM((T, L * S), jnp.float32)],
        compiler_params=pltpu.CompilerParams(
            dimension_semantics=("parallel",),
            vmem_limit_bytes=vmem_limit),
    )(x_btc, wfg, bfg, wrs, brs)

    # Unpack skips once: (B, T, L*S) -> (L, B, S, T); single XLA transpose.
    skips = jnp.transpose(skip_flat.reshape(B, T, L, S), (2, 0, 3, 1))
    res = jnp.transpose(res_btc, (0, 2, 1))
    return skips, res


# ----------------------------------------------------------------------------
# Pure-JAX reference (mirrors the PyTorch module, NCW layout) for validation
# ----------------------------------------------------------------------------
def _ref_causal_conv(x_nct, w_oik, b, dilation):
    pad = dilation * (w_oik.shape[2] - 1)
    out = jax.lax.conv_general_dilated(
        x_nct, w_oik, window_strides=(1,), padding=[(pad, 0)],
        rhs_dilation=(dilation,), dimension_numbers=("NCH", "OIH", "NCH"))
    return out + b[None, :, None]


def dilated_stack_ref(x_nct, torch_params):
    skips = []
    for p in torch_params:
        f = _ref_causal_conv(x_nct, p["wf"], p["bf"], p["dilation"])
        g = _ref_causal_conv(x_nct, p["wg"], p["bg"], p["dilation"])
        fx = jnp.tanh(f) * jax.nn.sigmoid(g)
        fx = jnp.einsum("oc,bct->bot", p["wr"][:, :, 0], fx) + p["br"][None, :, None]
        skip = jnp.einsum("oc,bct->bot", p["ws"][:, :, 0], fx) + p["bs"][None, :, None]
        x_nct = fx + x_nct
        skips.append(skip[None])
    return jnp.concatenate(skips, axis=0), x_nct


# ----------------------------------------------------------------------------
# Deterministic parameter init (PyTorch-style uniform(-1/sqrt(fan_in*k), ...))
# ----------------------------------------------------------------------------
def init_params(key, residual_size, skip_size, dilation_depth):
    C, S = residual_size, skip_size

    def u(k, shape, fan):
        bound = 1.0 / (fan ** 0.5)
        return jax.random.uniform(k, shape, jnp.float32, -bound, bound)

    params = []
    for layer in range(dilation_depth):
        key, *ks = jax.random.split(key, 9)
        params.append({
            "dilation": 2 ** layer,
            "wf": u(ks[0], (C, C, 2), 2 * C), "bf": u(ks[1], (C,), 2 * C),
            "wg": u(ks[2], (C, C, 2), 2 * C), "bg": u(ks[3], (C,), 2 * C),
            "wr": u(ks[4], (C, C, 1), C),     "br": u(ks[5], (C,), C),
            "ws": u(ks[6], (S, C, 1), C),     "bs": u(ks[7], (S,), C),
        })
    return params


if __name__ == "__main__":
    B, C, T = 2, 32, 16           # batch, residual_size (channels), seq len
    skip_size = 16
    dilation_depth = 3

    key = jax.random.PRNGKey(0)
    key, xk = jax.random.split(key)
    x = jax.random.normal(xk, (B, C, T), jnp.float32)   # NCW, like PyTorch
    params = init_params(key, C, skip_size, dilation_depth)

    skips_ref, res_ref = dilated_stack_ref(x, params)

    # f32 MXU path (Wr/Ws fusion reassociates the skip matmul -> tiny drift)
    prepped_f32 = prepare_params(params, compute_dtype=jnp.float32)
    skips, res = dilated_stack_pallas(x, prepped_f32)
    skips = jax.block_until_ready(skips)
    res = jax.block_until_ready(res)

    assert skips.shape == (dilation_depth, B, skip_size, T)
    assert res.shape == (B, C, T)
    assert jnp.allclose(skips, skips_ref, rtol=1e-4, atol=1e-4)
    assert jnp.allclose(res, res_ref, rtol=1e-4, atol=1e-4)

    # bf16 MXU path (f32 accumulation, f32 residual chain): loose tolerance
    prepped_bf16 = prepare_params(params, compute_dtype=jnp.bfloat16)
    skips16, res16 = dilated_stack_pallas(x, prepped_bf16)
    skips16 = jax.block_until_ready(skips16)
    res16 = jax.block_until_ready(res16)
    assert jnp.allclose(skips16, skips_ref, rtol=5e-2, atol=5e-2)
    assert jnp.allclose(res16, res_ref, rtol=5e-2, atol=5e-2)

    print("KERNEL_OK")
</pallas_src>

<mosaic_0001>
module attributes {stable_mosaic.version = 11 : i64} {
  func.func @_dilated_stack_kernel(%arg0: i32, %arg1: memref<1x16x32xf32, #tpu.memory_space<vmem>>, %arg2: memref<3x64x64xf32, #tpu.memory_space<vmem>>, %arg3: memref<3x1x64xf32, #tpu.memory_space<vmem>>, %arg4: memref<3x32x48xf32, #tpu.memory_space<vmem>>, %arg5: memref<3x1x48xf32, #tpu.memory_space<vmem>>, %arg6: memref<1x16x48xf32, #tpu.memory_space<vmem>>, %arg7: memref<1x16x32xf32, #tpu.memory_space<vmem>>, %arg8: memref<16x48xf32, #tpu.memory_space<vmem>>) attributes {dimension_semantics = [#tpu.dimension_semantics<parallel>], iteration_bounds = array<i64: 2>, scalar_prefetch = 0 : i64, scratch_operands = 1 : i64, tpu.core_type = #tpu.core_type<tc>, window_params = [{transform_indices = @transform_0, window_bounds = array<i64: 1, 16, 32>}, {pipeline_mode = #tpu.pipeline_mode<synchronous>, transform_indices = @transform_1, window_bounds = array<i64: 3, 64, 64>}, {pipeline_mode = #tpu.pipeline_mode<synchronous>, transform_indices = @transform_2, window_bounds = array<i64: 3, 1, 64>}, {pipeline_mode = #tpu.pipeline_mode<synchronous>, transform_indices = @transform_3, window_bounds = array<i64: 3, 32, 48>}, {pipeline_mode = #tpu.pipeline_mode<synchronous>, transform_indices = @transform_4, window_bounds = array<i64: 3, 1, 48>}, {transform_indices = @transform_5, window_bounds = array<i64: 1, 16, 48>}, {transform_indices = @transform_6, window_bounds = array<i64: 1, 16, 32>}]} {
    %c0 = arith.constant 0 : index
    %c0_0 = arith.constant 0 : index
    %c0_1 = arith.constant 0 : index
    %0 = vector.load %arg1[%c0, %c0_0, %c0_1] : memref<1x16x32xf32, #tpu.memory_space<vmem>>, vector<1x16x32xf32>
    %1 = vector.shape_cast %0 : vector<1x16x32xf32> to vector<16x32xf32>
    %2 = tpu.iota {dimensions = array<i32: 0>} : vector<16x32xi32>
    %c1_i32 = arith.constant 1 : i32
    %3 = tpu.dynamic_rotate %1 by %c1_i32 dim 0 : vector<16x32xf32>, i32 -> vector<16x32xf32>
    %c1_i32_2 = arith.constant 1 : i32
    %4 = vector.broadcast %c1_i32_2 : i32 to vector<16x32xi32>
    %5 = arith.cmpi slt, %2, %4 : vector<16x32xi32>
    %cst = arith.constant 0.000000e+00 : f32
    %6 = vector.broadcast %cst : f32 to vector<16x32xf32>
    %7 = arith.select %5, %6, %3 : vector<16x32xi1>, vector<16x32xf32>
    %8 = tpu.concatenate %7, %1 in 1 : vector<16x32xf32>, vector<16x32xf32> -> vector<16x64xf32>
    %c0_3 = arith.constant 0 : index
    %c0_4 = arith.constant 0 : index
    %c0_5 = arith.constant 0 : index
    %9 = vector.load %arg2[%c0_3, %c0_4, %c0_5] : memref<3x64x64xf32, #tpu.memory_space<vmem>>, vector<1x64x64xf32>
    %10 = vector.shape_cast %9 : vector<1x64x64xf32> to vector<64x64xf32>
    %cst_6 = arith.constant dense<0.000000e+00> : vector<16x64xf32>
    %11 = tpu.matmul %8, %10, %cst_6 {dimension_numbers = #tpu.dot_dimension_numbers<[1], [0], [0], [1], [0, 0, 1, 1], [], []>} : vector<16x64xf32>, vector<64x64xf32>, vector<16x64xf32> -> vector<16x64xf32>
    %c0_7 = arith.constant 0 : index
    %c0_8 = arith.constant 0 : index
    %c0_9 = arith.constant 0 : index
    %12 = vector.load %arg3[%c0_7, %c0_8, %c0_9] : memref<3x1x64xf32, #tpu.memory_space<vmem>>, vector<1x1x64xf32>
    %13 = vector.shape_cast %12 : vector<1x1x64xf32> to vector<1x64xf32>
    %14 = vector.broadcast %13 : vector<1x64xf32> to vector<16x64xf32>
    %15 = arith.addf %11, %14 : vector<16x64xf32>
    %16 = vector.extract_strided_slice %15 {offsets = [0, 0], sizes = [16, 32], strides = [1, 1]} : vector<16x64xf32> to vector<16x32xf32>
    %17 = math.tanh %16 : vector<16x32xf32>
    %18 = vector.extract_strided_slice %15 {offsets = [0, 32], sizes = [16, 32], strides = [1, 1]} : vector<16x64xf32> to vector<16x32xf32>
    %19 = arith.negf %18 : vector<16x32xf32>
    %20 = math.exp %19 : vector<16x32xf32>
    %cst_10 = arith.constant 1.000000e+00 : f32
    %21 = vector.broadcast %cst_10 : f32 to vector<16x32xf32>
    %22 = arith.addf %21, %20 : vector<16x32xf32>
    %23 = arith.divf %21, %22 : vector<16x32xf32>
    %24 = arith.mulf %17, %23 : vector<16x32xf32>
    %c0_11 = arith.constant 0 : index
    %c0_12 = arith.constant 0 : index
    %c0_13 = arith.constant 0 : index
    %25 = vector.load %arg4[%c0_11, %c0_12, %c0_13] : memref<3x32x48xf32, #tpu.memory_space<vmem>>, vector<1x32x48xf32>
    %26 = vector.shape_cast %25 : vector<1x32x48xf32> to vector<32x48xf32>
    %cst_14 = arith.constant dense<0.000000e+00> : vector<16x48xf32>
    %27 = tpu.matmul %24, %26, %cst_14 {dimension_numbers = #tpu.dot_dimension_numbers<[1], [0], [0], [1], [0, 0, 1, 1], [], []>} : vector<16x32xf32>, vector<32x48xf32>, vector<16x48xf32> -> vector<16x48xf32>
    %c0_15 = arith.constant 0 : index
    %c0_16 = arith.constant 0 : index
    %c0_17 = arith.constant 0 : index
    %28 = vector.load %arg5[%c0_15, %c0_16, %c0_17] : memref<3x1x48xf32, #tpu.memory_space<vmem>>, vector<1x1x48xf32>
    %29 = vector.shape_cast %28 : vector<1x1x48xf32> to vector<1x48xf32>
    %30 = vector.broadcast %29 : vector<1x48xf32> to vector<16x48xf32>
    %31 = arith.addf %27, %30 : vector<16x48xf32>
    %32 = vector.extract_strided_slice %31 {offsets = [0, 32], sizes = [16, 16], strides = [1, 1]} : vector<16x48xf32> to vector<16x16xf32>
    %c0_18 = arith.constant 0 : index
    %c0_19 = arith.constant 0 : index
    %33 = vector.load %arg8[%c0_18, %c0_19] : memref<16x48xf32, #tpu.memory_space<vmem>>, vector<16x16xf32>
    tpu.vector_store %arg8[%c0_18, %c0_19], %32 {strides = array<i32>} : memref<16x48xf32, #tpu.memory_space<vmem>>, vector<16x16xf32>,
    %34 = vector.extract_strided_slice %31 {offsets = [0, 0], sizes = [16, 32], strides = [1, 1]} : vector<16x48xf32> to vector<16x32xf32>
    %35 = arith.addf %34, %1 : vector<16x32xf32>
    %c2_i32 = arith.constant 2 : i32
    %36 = tpu.dynamic_rotate %35 by %c2_i32 dim 0 : vector<16x32xf32>, i32 -> vector<16x32xf32>
    %c2_i32_20 = arith.constant 2 : i32
    %37 = vector.broadcast %c2_i32_20 : i32 to vector<16x32xi32>
    %38 = arith.cmpi slt, %2, %37 : vector<16x32xi32>
    %cst_21 = arith.constant 0.000000e+00 : f32
    %39 = vector.broadcast %cst_21 : f32 to vector<16x32xf32>
    %40 = arith.select %38, %39, %36 : vector<16x32xi1>, vector<16x32xf32>
    %41 = tpu.concatenate %40, %35 in 1 : vector<16x32xf32>, vector<16x32xf32> -> vector<16x64xf32>
    %c1 = arith.constant 1 : index
    %c0_22 = arith.constant 0 : index
    %c0_23 = arith.constant 0 : index
    %42 = vector.load %arg2[%c1, %c0_22, %c0_23] : memref<3x64x64xf32, #tpu.memory_space<vmem>>, vector<1x64x64xf32>
    %43 = vector.shape_cast %42 : vector<1x64x64xf32> to vector<64x64xf32>
    %cst_24 = arith.constant dense<0.000000e+00> : vector<16x64xf32>
    %44 = tpu.matmul %41, %43, %cst_24 {dimension_numbers = #tpu.dot_dimension_numbers<[1], [0], [0], [1], [0, 0, 1, 1], [], []>} : vector<16x64xf32>, vector<64x64xf32>, vector<16x64xf32> -> vector<16x64xf32>
    %c1_25 = arith.constant 1 : index
    %c0_26 = arith.constant 0 : index
    %c0_27 = arith.constant 0 : index
    %45 = vector.load %arg3[%c1_25, %c0_26, %c0_27] : memref<3x1x64xf32, #tpu.memory_space<vmem>>, vector<1x1x64xf32>
    %46 = vector.shape_cast %45 : vector<1x1x64xf32> to vector<1x64xf32>
    %47 = vector.broadcast %46 : vector<1x64xf32> to vector<16x64xf32>
    %48 = arith.addf %44, %47 : vector<16x64xf32>
    %49 = vector.extract_strided_slice %48 {offsets = [0, 0], sizes = [16, 32], strides = [1, 1]} : vector<16x64xf32> to vector<16x32xf32>
    %50 = math.tanh %49 : vector<16x32xf32>
    %51 = vector.extract_strided_slice %48 {offsets = [0, 32], sizes = [16, 32], strides = [1, 1]} : vector<16x64xf32> to vector<16x32xf32>
    %52 = arith.negf %51 : vector<16x32xf32>
    %53 = math.exp %52 : vector<16x32xf32>
    %cst_28 = arith.constant 1.000000e+00 : f32
    %54 = vector.broadcast %cst_28 : f32 to vector<16x32xf32>
    %55 = arith.addf %54, %53 : vector<16x32xf32>
    %56 = arith.divf %54, %55 : vector<16x32xf32>
    %57 = arith.mulf %50, %56 : vector<16x32xf32>
    %c1_29 = arith.constant 1 : index
    %c0_30 = arith.constant 0 : index
    %c0_31 = arith.constant 0 : index
    %58 = vector.load %arg4[%c1_29, %c0_30, %c0_31] : memref<3x32x48xf32, #tpu.memory_space<vmem>>, vector<1x32x48xf32>
    %59 = vector.shape_cast %58 : vector<1x32x48xf32> to vector<32x48xf32>
    %cst_32 = arith.constant dense<0.000000e+00> : vector<16x48xf32>
    %60 = tpu.matmul %57, %59, %cst_32 {dimension_numbers = #tpu.dot_dimension_numbers<[1], [0], [0], [1], [0, 0, 1, 1], [], []>} : vector<16x32xf32>, vector<32x48xf32>, vector<16x48xf32> -> vector<16x48xf32>
    %c1_33 = arith.constant 1 : index
    %c0_34 = arith.constant 0 : index
    %c0_35 = arith.constant 0 : index
    %61 = vector.load %arg5[%c1_33, %c0_34, %c0_35] : memref<3x1x48xf32, #tpu.memory_space<vmem>>, vector<1x1x48xf32>
    %62 = vector.shape_cast %61 : vector<1x1x48xf32> to vector<1x48xf32>
    %63 = vector.broadcast %62 : vector<1x48xf32> to vector<16x48xf32>
    %64 = arith.addf %60, %63 : vector<16x48xf32>
    %65 = vector.extract_strided_slice %64 {offsets = [0, 32], sizes = [16, 16], strides = [1, 1]} : vector<16x48xf32> to vector<16x16xf32>
    %c0_36 = arith.constant 0 : index
    %c16 = arith.constant 16 : index
    %66 = vector.load %arg8[%c0_36, %c16] : memref<16x48xf32, #tpu.memory_space<vmem>>, vector<16x16xf32>
    tpu.vector_store %arg8[%c0_36, %c16], %65 {strides = array<i32>} : memref<16x48xf32, #tpu.memory_space<vmem>>, vector<16x16xf32>,
    %67 = vector.extract_strided_slice %64 {offsets = [0, 0], sizes = [16, 32], strides = [1, 1]} : vector<16x48xf32> to vector<16x32xf32>
    %68 = arith.addf %67, %35 : vector<16x32xf32>
    %c4_i32 = arith.constant 4 : i32
    %69 = tpu.dynamic_rotate %68 by %c4_i32 dim 0 : vector<16x32xf32>, i32 -> vector<16x32xf32>
    %c4_i32_37 = arith.constant 4 : i32
    %70 = vector.broadcast %c4_i32_37 : i32 to vector<16x32xi32>
    %71 = arith.cmpi slt, %2, %70 : vector<16x32xi32>
    %cst_38 = arith.constant 0.000000e+00 : f32
    %72 = vector.broadcast %cst_38 : f32 to vector<16x32xf32>
    %73 = arith.select %71, %72, %69 : vector<16x32xi1>, vector<16x32xf32>
    %74 = tpu.concatenate %73, %68 in 1 : vector<16x32xf32>, vector<16x32xf32> -> vector<16x64xf32>
    %c2 = arith.constant 2 : index
    %c0_39 = arith.constant 0 : index
    %c0_40 = arith.constant 0 : index
    %75 = vector.load %arg2[%c2, %c0_39, %c0_40] : memref<3x64x64xf32, #tpu.memory_space<vmem>>, vector<1x64x64xf32>
    %76 = vector.shape_cast %75 : vector<1x64x64xf32> to vector<64x64xf32>
    %cst_41 = arith.constant dense<0.000000e+00> : vector<16x64xf32>
    %77 = tpu.matmul %74, %76, %cst_41 {dimension_numbers = #tpu.dot_dimension_numbers<[1], [0], [0], [1], [0, 0, 1, 1], [], []>} : vector<16x64xf32>, vector<64x64xf32>, vector<16x64xf32> -> vector<16x64xf32>
    %c2_42 = arith.constant 2 : index
    %c0_43 = arith.constant 0 : index
    %c0_44 = arith.constant 0 : index
    %78 = vector.load %arg3[%c2_42, %c0_43, %c0_44] : memref<3x1x64xf32, #tpu.memory_space<vmem>>, vector<1x1x64xf32>
    %79 = vector.shape_cast %78 : vector<1x1x64xf32> to vector<1x64xf32>
    %80 = vector.broadcast %79 : vector<1x64xf32> to vector<16x64xf32>
    %81 = arith.addf %77, %80 : vector<16x64xf32>
    %82 = vector.extract_strided_slice %81 {offsets = [0, 0], sizes = [16, 32], strides = [1, 1]} : vector<16x64xf32> to vector<16x32xf32>
    %83 = math.tanh %82 : vector<16x32xf32>
    %84 = vector.extract_strided_slice %81 {offsets = [0, 32], sizes = [16, 32], strides = [1, 1]} : vector<16x64xf32> to vector<16x32xf32>
    %85 = arith.negf %84 : vector<16x32xf32>
    %86 = math.exp %85 : vector<16x32xf32>
    %cst_45 = arith.constant 1.000000e+00 : f32
    %87 = vector.broadcast %cst_45 : f32 to vector<16x32xf32>
    %88 = arith.addf %87, %86 : vector<16x32xf32>
    %89 = arith.divf %87, %88 : vector<16x32xf32>
    %90 = arith.mulf %83, %89 : vector<16x32xf32>
    %c2_46 = arith.constant 2 : index
    %c0_47 = arith.constant 0 : index
    %c0_48 = arith.constant 0 : index
    %91 = vector.load %arg4[%c2_46, %c0_47, %c0_48] : memref<3x32x48xf32, #tpu.memory_space<vmem>>, vector<1x32x48xf32>
    %92 = vector.shape_cast %91 : vector<1x32x48xf32> to vector<32x48xf32>
    %cst_49 = arith.constant dense<0.000000e+00> : vector<16x48xf32>
    %93 = tpu.matmul %90, %92, %cst_49 {dimension_numbers = #tpu.dot_dimension_numbers<[1], [0], [0], [1], [0, 0, 1, 1], [], []>} : vector<16x32xf32>, vector<32x48xf32>, vector<16x48xf32> -> vector<16x48xf32>
    %c2_50 = arith.constant 2 : index
    %c0_51 = arith.constant 0 : index
    %c0_52 = arith.constant 0 : index
    %94 = vector.load %arg5[%c2_50, %c0_51, %c0_52] : memref<3x1x48xf32, #tpu.memory_space<vmem>>, vector<1x1x48xf32>
    %95 = vector.shape_cast %94 : vector<1x1x48xf32> to vector<1x48xf32>
    %96 = vector.broadcast %95 : vector<1x48xf32> to vector<16x48xf32>
    %97 = arith.addf %93, %96 : vector<16x48xf32>
    %98 = vector.extract_strided_slice %97 {offsets = [0, 32], sizes = [16, 16], strides = [1, 1]} : vector<16x48xf32> to vector<16x16xf32>
    %c0_53 = arith.constant 0 : index
    %c32 = arith.constant 32 : index
    %99 = vector.load %arg8[%c0_53, %c32] : memref<16x48xf32, #tpu.memory_space<vmem>>, vector<16x16xf32>
    tpu.vector_store %arg8[%c0_53, %c32], %98 {strides = array<i32>} : memref<16x48xf32, #tpu.memory_space<vmem>>, vector<16x16xf32>,
    %100 = vector.extract_strided_slice %97 {offsets = [0, 0], sizes = [16, 32], strides = [1, 1]} : vector<16x48xf32> to vector<16x32xf32>
    %101 = arith.addf %100, %68 : vector<16x32xf32>
    %c0_54 = arith.constant 0 : index
    %c0_55 = arith.constant 0 : index
    %102 = vector.load %arg8[%c0_54, %c0_55] : memref<16x48xf32, #tpu.memory_space<vmem>>, vector<16x48xf32>
    %c0_56 = arith.constant 0 : index
    %c0_57 = arith.constant 0 : index
    %c0_58 = arith.constant 0 : index
    %103 = vector.load %arg6[%c0_56, %c0_57, %c0_58] : memref<1x16x48xf32, #tpu.memory_space<vmem>>, vector<1x16x48xf32>
    %104 = vector.shape_cast %103 : vector<1x16x48xf32> to vector<16x48xf32>
    %105 = vector.shape_cast %102 : vector<16x48xf32> to vector<1x16x48xf32>
    tpu.vector_store %arg6[%c0_56, %c0_57, %c0_58], %105 {strides = array<i32>} : memref<1x16x48xf32, #tpu.memory_space<vmem>>, vector<1x16x48xf32>,
    %c0_59 = arith.constant 0 : index
    %c0_60 = arith.constant 0 : index
    %c0_61 = arith.constant 0 : index
    %106 = vector.load %arg7[%c0_59, %c0_60, %c0_61] : memref<1x16x32xf32, #tpu.memory_space<vmem>>, vector<1x16x32xf32>
    %107 = vector.shape_cast %106 : vector<1x16x32xf32> to vector<16x32xf32>
    %108 = vector.shape_cast %101 : vector<16x32xf32> to vector<1x16x32xf32>
    tpu.vector_store %arg7[%c0_59, %c0_60, %c0_61], %108 {strides = array<i32>} : memref<1x16x32xf32, #tpu.memory_space<vmem>>, vector<1x16x32xf32>,
    return
  }
  func.func @transform_0(%arg0: i32) -> (i32, i32, i32) {
    %c0_i32 = arith.constant 0 : i32
    %c0_i32_0 = arith.constant 0 : i32
    %c0_i32_1 = arith.constant 0 : i32
    return %arg0, %c0_i32, %c0_i32_0 : i32, i32, i32
  }
  func.func @transform_1(%arg0: i32) -> (i32, i32, i32) {
    %c0_i32 = arith.constant 0 : i32
    %c0_i32_0 = arith.constant 0 : i32
    %c0_i32_1 = arith.constant 0 : i32
    %c0_i32_2 = arith.constant 0 : i32
    return %c0_i32, %c0_i32_0, %c0_i32_1 : i32, i32, i32
  }
  func.func @transform_2(%arg0: i32) -> (i32, i32, i32) {
    %c0_i32 = arith.constant 0 : i32
    %c0_i32_0 = arith.constant 0 : i32
    %c0_i32_1 = arith.constant 0 : i32
    %c0_i32_2 = arith.constant 0 : i32
    return %c0_i32, %c0_i32_0, %c0_i32_1 : i32, i32, i32
  }
  func.func @transform_3(%arg0: i32) -> (i32, i32, i32) {
    %c0_i32 = arith.constant 0 : i32
    %c0_i32_0 = arith.constant 0 : i32
    %c0_i32_1 = arith.constant 0 : i32
    %c0_i32_2 = arith.constant 0 : i32
    return %c0_i32, %c0_i32_0, %c0_i32_1 : i32, i32, i32
  }
  func.func @transform_4(%arg0: i32) -> (i32, i32, i32) {
    %c0_i32 = arith.constant 0 : i32
    %c0_i32_0 = arith.constant 0 : i32
    %c0_i32_1 = arith.constant 0 : i32
    %c0_i32_2 = arith.constant 0 : i32
    return %c0_i32, %c0_i32_0, %c0_i32_1 : i32, i32, i32
  }
  func.func @transform_5(%arg0: i32) -> (i32, i32, i32) {
    %c0_i32 = arith.constant 0 : i32
    %c0_i32_0 = arith.constant 0 : i32
    %c0_i32_1 = arith.constant 0 : i32
    return %arg0, %c0_i32, %c0_i32_0 : i32, i32, i32
  }
  func.func @transform_6(%arg0: i32) -> (i32, i32, i32) {
    %c0_i32 = arith.constant 0 : i32
    %c0_i32_0 = arith.constant 0 : i32
    %c0_i32_1 = arith.constant 0 : i32
    return %arg0, %c0_i32, %c0_i32_0 : i32, i32, i32
  }
}

</mosaic_0001>

<bundles_post_ra>
// kernel: tpu_custom_call.1
= control target key start
LH: loop header
LB: loop body
LE: loop exit
PB: predicated region body
PF: predicated region fallthrough
CT: control target
= control target key end

     0   :  { %12 = vsyncpa [#allocation4], 0  ;;  %s2089_s0 = inlined_call_operand.hbm [shape: f32[2,16,32], index: 0, kind: input, shape index: {}]   ;;  %s2090_s1 = inlined_call_operand.hbm [shape: f32[3,64,64], index: 1, kind: input, shape index: {}]   ;;  %s2091_s2 = inlined_call_operand.vmem [shape: f32[3,1,64], index: 2, kind: input, shape index: {}]   ;;  %s2092_s3 = inlined_call_operand.hbm [shape: f32[3,32,48], index: 3, kind: input, shape index: {}]   ;;  %s2093_s4 = inlined_call_operand.vmem [shape: f32[3,1,48], index: 4, kind: input, shape index: {}]   ;;  %s2094_s5 = inlined_call_operand.hbm [shape: f32[2,16,48], index: 5, kind: output, shape index: {0}]   ;;  %s2095_s6 = inlined_call_operand.hbm [shape: f32[2,16,32], index: 6, kind: output, shape index: {1}]  }
   0x1   :  { %14 = vsyncpa [#allocation4 + $0x1], 0 }
   0x2   :  { %15 = vsyncpa [#allocation7], 0 }
   0x3   :  { %16 = vsyncpa [#allocation5], 0 }
   0x4   :  { %18 = vsyncpa [#allocation5 + $0x1], 0 }
   0x5   :  { %19 = vsyncpa [#allocation11], 0 }
   0x6   :  { %21 = vsyncpa [#allocation11 + $0x1], 0  ;;  %s1745_s21 = smov 0   ;;  %s1747_s22 = smov 0  }
   0x7   :  { %s1749_s23 = smov 0   ;;  %s1751_s24 = smov 0  }
   0x8 LB: > { %s1766_s25 = sadd.s32 4294967295, %s1696_s24   ;;  %s1212_s26 = sadd.s32 4294967294, %s1696_s24   ;;  %s1696_s24 = sphi %s1751_s24, %s2121_s24   ;;  %s1692_s23 = sphi %s1749_s23, %s2120_s23   ;;  %s1688_s22 = sphi %s1747_s22, %s2119_s22   ;;  %s1684_s21 = sphi %s1745_s21, %s2118_s21  }
   0x9   : > { %p47_p0 = scmp.ne.s32.totalorder %s1688_s22, %s1684_s21  ;;  %p2096_p1 = scmp.eq.s32.totalorder %s1766_s25, 0 }
   0xa   : > { %p155_p2 = scmp.eq.s32.totalorder %s1766_s25, 1  ;;  %p161_p3 = scmp.eq.s32.totalorder %s1212_s26, 1 }
   0xb   : > { %p1775_p4 = por %p2096_p1, %p47_p0  ;;  %p1213_p5 = scmp.ge.s32.totalorder %s1696_s24, 1 }
   0xc   : > { %p1780_p6 = por %p161_p3, %p47_p0  ;;  %p194_p7 = scmp.lt.s32.totalorder %s1696_s24, 3 }
   0xd   : > { %s2102_s27 = scalar_select %p1775_p4, 1, 0 }
   0xe   : > { %s2103_s28 = scalar_select %p1780_p6, 1, 0 }
   0xf   : > { %p1785_p8 = pnand %p1213_p5, %p194_p7  ;;  %s1698_s30 = smov [#allocation6]  }
  0x10   : > { %s206_s7 = sshll.u32 %s1698_s30, 4  ;;  %s1699_s9 = smov [#allocation8]   ;;  %s207_s7 = int_to_ptr.vmem [resolvable:$true] %s206_s7 }
  0x11   : > { %s2104_s29 = scalar_select %p1785_p8, 1, 0 }
  0x12   : > { %p1417_p9 = pneg %p1785_p8  ;;  %s222_s10 = sshll.u32 %s1699_s9, 4  ;;  %s223_s10 = int_to_ptr.vmem [resolvable:$true] %s222_s10 }
  0x13   : > { %s1529_s11 = scalar_lea.vmem %s207_s7, 3072  ;;  %p1537_p5 = scmp.lt.s32.totalorder %s207_s7, %s207_s7 }
  0x14   : > { %p1794_p11 = pnand %p1417_p9, %p2096_p1  ;;  %p1530_p13 = scmp.ne.s32.totalorder %s207_s7, %s1529_s11 }
  0x15   : > { %p1538_p7 = scmp.lt.s32.totalorder %s1529_s11, %s1529_s11 }
  0x16   : > { %p1520_p12 = pneg %p1794_p11 }
  0x17   : > { %p1539_p10 = por %p1538_p7, %p1537_p5 }
  0x18   : > { %p1532_p0 = pnand %p1530_p13, %p1520_p12 }
  0x1a   : > { %p1533_p3 = pneg %p1532_p0 }
  0x1c   : > { %p1540_p9 = pnand %p1539_p10, %p1533_p3 }
  0x1e   : > { %1543 = shalt.err (!%p1540_p9)
}
  0x1f   : > { %s2097_s12 = smov 128   ;;  %s2098_s13 = smov 8  }
  0x20   : > { %1420 = dma.hbm_to_vmem [thread:$0]  (!%p1794_p11), %s2090_s1, 3072, %s207_s7, [#allocation7], %s2097_s12, %s2097_s12, %s2098_s13  }
  0x21   : > { %s1555_s16 = scalar_lea.vmem %s223_s10, 1536  ;;  %p1563_p10 = scmp.lt.s32.totalorder %s223_s10, %s223_s10 }
  0x22   : > { %p1556_p13 = scmp.ne.s32.totalorder %s223_s10, %s1555_s16  ;;  %p1564_p3 = scmp.lt.s32.totalorder %s1555_s16, %s1555_s16 }
  0x24   : > { %p1558_p0 = pnand %p1556_p13, %p1520_p12  ;;  %p1565_p7 = por %p1564_p3, %p1563_p10 }
  0x26   : > { %p1559_p5 = pneg %p1558_p0 }
  0x28   : > { %p1566_p9 = pnand %p1565_p7, %p1559_p5 }
  0x2a   : > { %1569 = shalt.err (!%p1566_p9)
}
  0x2b   : > { %1423 = dma.hbm_to_vmem [thread:$0]  (!%p1794_p11), %s2092_s3, 1536, %s223_s10, [#allocation7], %s2097_s12, %s2097_s12, %s2098_s13  }
  0x2c   : > { %s1823_s19 = sadd.s32 1, %s1696_s24   ;;  %s34_s20 = sadd.s32 1, %s1692_s23 }
  0x2d   : > { %s31_s26 = ssub.s32 %s1696_s24, %s1823_s19  ;;  %p41_p12 = scmp.ne.s32.totalorder %s1692_s23, %s1688_s22 }
  0x2e   : > { %p32_p13 = scmp.eq.s32.totalorder %s31_s26, 0  ;;  %p42_p0 = scmp.eq.s32.totalorder %s1696_s24, 0 }
  0x2f   : > { %p1833_p5 = por %p155_p2, %p41_p12  ;;  %p1437_p10 = scmp.lt.s32.totalorder %s1696_s24, 2 }
  0x30   : > { %s1839_s7 = scalar_select %p32_p13, %s1692_s23, %s34_s20  }
  0x31   : > { %s2106_s30 = scalar_select %p1833_p5, 1, 0 }
  0x32   : > { %p43_p3 = por %p42_p0, %p41_p12  ;;  %s239_s8 = sand.u32 1, %s1692_s23  }
  0x33   : > { %s1217_s9 = sshll.u32 %s239_s8, 4  ;;  %s1262_s10 = sshll.u32 %s1696_s24, 8 }
  0x34   : > { %s1846_s15 = scalar_lea.hbm %s2089_s0, %s1262_s10  ;;  %s243_s16 = scalar_lea.vmem [#allocation3], %s1217_s9 }
  0x35   : > { %s250_s17 = sshll.u32 %s243_s16, 4  ;;  %p1850_p2 = pnand %p1437_p10, %p43_p3  ;;  %s1848_s17 = int_to_ptr.vmem [resolvable:$true] %s250_s17 }
  0x36   : > { %s1854_s20 = scalar_lea.sflag [#allocation4], %s239_s8  ;;  %s1570_s26 = scalar_lea.hbm %s1846_s15, 256 }
  0x37   : > { %p1571_p11 = scmp.ne.s32.totalorder %s1846_s15, %s1570_s26  ;;  %p1572_p7 = pneg %p1850_p2 }
  0x38   : > { %s1575_s9 = scalar_lea.hbm %s2089_s0, 512  ;;  %p1576_p13 = scmp.lt.s32.totalorder %s1846_s15, %s2089_s0 }
  0x39   : > { %p1573_p9 = pnand %p1572_p7, %p1571_p11  ;;  %p1577_p0 = scmp.lt.s32.totalorder %s1575_s9, %s1570_s26 }
  0x3b   : > { %p1574_p12 = pneg %p1573_p9  ;;  %p1578_p10 = por %p1577_p0, %p1576_p13 }
  0x3d   : > { %p1579_p3 = pnand %p1578_p10, %p1574_p12 }
  0x3f   : > { %1582 = shalt.err (!%p1579_p3)
}
  0x40   : > { %s1583_s8 = scalar_lea.vmem %s1848_s17, 256  ;;  %s1702_s12 = smov [#allocation3]  }
  0x41   : > { %p1584_p1 = scmp.ne.s32.totalorder %s1848_s17, %s1583_s8  ;;  %s1588_s13 = sshll.u32 %s1702_s12, 4  ;;  %s1589_s13 = int_to_ptr.vmem [resolvable:$false] %s1588_s13 }
  0x42   : > { %s1590_s10 = scalar_lea.vmem %s1589_s13, 512  ;;  %p1591_p9 = scmp.lt.s32.totalorder %s1848_s17, %s1589_s13 }
  0x43   : > { %p1586_p6 = pnand %p1584_p1, %p1572_p7  ;;  %p1592_p5 = scmp.lt.s32.totalorder %s1590_s10, %s1583_s8 }
  0x45   : > { %p1587_p11 = pneg %p1586_p6  ;;  %p1593_p4 = por %p1592_p5, %p1591_p9 }
  0x47   : > { %p1594_p8 = pnand %p1593_p4, %p1587_p11 }
  0x49   : > { %1597 = shalt.err (!%p1594_p8)
}
  0x4a   : > { %s2108_s26 = smov 8   ;;  %s2109_s11 = smov 128  }
  0x4b   : > { %1427 = dma.hbm_to_vmem [thread:$0]  (!%p1850_p2), %s1846_s15, 256, %s1848_s17, %s1854_s20, %s2109_s11, %s2109_s11, %s2108_s26  }
  0x4c   : > { %p2110_p1 = scmp.ne.s32.totalorder %s2104_s29, 0 }
  0x4d   : > { %s1881_s12 = sand.u32 (!%p2110_p1), 1, %s1688_s22   ;;  %p2111_p4 = scmp.ne.s32.totalorder (!%p2110_p1), %s2102_s27, 0 }
  0x4e   : > { %262 = sbr.rel (%p2110_p1) target bundleno = 2120 (0x848), region = 40  ;;  %s1884_s13 = sshll.u32 (!%p2110_p1), %s1881_s12, 4 }
  0x4f   : > { %s265_s18 = scalar_lea.sflag (!%p2110_p1), [#allocation4], %s1881_s12  ;;  %s268_s9 = scalar_lea.vmem (!%p2110_p1), [#allocation3], %s1884_s13 }
  0x53   : > { %1667 = dma.done.wait (%p2111_p4), %s265_s18, 256  }
  0x54   : > { %1669 = vsyncadd (%p2111_p4), %s265_s18, 4294967040  ;;  %p2112_p6 = scmp.eq.s32.totalorder %s1766_s25, 0 }
  0x56   : > { %1671 = dma.done.wait (%p2112_p6), [#allocation7], 4608   ;;  %p2113_p8 = pmov %p2112_p6 }
  0x57   : > { %v1896_v0 = vld [vmem:[%s268_s9] sm:$0xff]  ;;  %v341_v1 = vld [vmem:[#allocation6 + $0x38] sm:$0xff]  ;;  %s1703_s29 = smov 32   ;;  %v339_v4 = vld [vmem:[#allocation6 + $0x28] sm:$0xff]  ;;  %v312_v10 = vlaneseq  ;;  %vm331_vm1 = vcmask 261120   ;;  %vm349_vm2 = vcmask 523264  }
  0x58   : > { %1673 = vsyncadd (%p2113_p8), [#allocation7], 4294962688  ;;  %325 = vrot.lane.b32.xlu0 %v1896_v0, %s1703_s29  ;;  %1313 = vmatprep.subr.mxu0 %v341_v1  ;;  %v340_v2 = vld [vmem:[#allocation6 + $0x30] sm:$0xff]  ;;  %v1900_v3 = vld [vmem:[%s268_s9 + $0x8] sm:$0xff]  ;;  %v315_v12 = vrot.slane %v1896_v0, 7  ;;  %s1704_s17 = smov 96  }
  0x59   : > { %1314 = vmatpush3.msra.mxu0 %v341_v1  ;;  %v338_v5 = vld [vmem:[#allocation6 + $0x20] sm:$0xff]  ;;  %v337_v6 = vld [vmem:[#allocation6 + $0x18] sm:$0xff]  ;;  %v336_v7 = vld [vmem:[#allocation6 + $0x10] sm:$0xff]  ;;  %v1904_v11 = vshrl.u32 %v312_v10, 7  ;;  %v316_v13 = vrot.slane %v1900_v3, 7  ;;  %s1705_s9 = smov 112  }
  0x5a   : > { %1315 = vmatprep.subr.mxu0 %v340_v2  ;;  %v335_v8 = vld [vmem:[#allocation6 + $0x8] sm:$0xff]  ;;  %v334_v9 = vld [vmem:[#allocation6] sm:$0xff]  ;;  %v458_v21 = vld [vmem:[#allocation8 + $0x18] sm:$0xff]  ;;  %vm555_vm5 = vcmask 130048   ;;  %vm802_vm6 = vcmask 261248   ;;  %vm1041_vm7 = vcmask 392448  }
  0x5b   : > { %1316 = vmatpush3.msra.mxu0 %v340_v2  ;;  %vm317_vm0 = vcmp.lt.s32.totalorder %v1904_v11, 1  ;;  %1332 = vmatprep.subr.mxu1 %v458_v21  ;;  %v1226_v22 = vld [vmem:[%s2091_s2] ss:$0 sm:$0xff]  ;;  %v456_v34 = vld [vmem:[#allocation8 + $0x8] sm:$0xff]  ;;  %v455_v35 = vld [vmem:[#allocation8] sm:$0xff]  ;;  %vm562_vm3 = vcmp.lt.s32.totalorder %v1904_v11, 2 }
  0x5c   : > { %327 = vrot.lane.b32.xlu0 %v1900_v3, %s1703_s29  ;;  %1317 = vmatprep.subr.mxu0 %v339_v4  ;;  %v319_v14 = vsel %vm317_vm0, %v316_v13, %v315_v12  ;;  %v318_v18 = vsel %vm317_vm0, %v315_v12, %v316_v13  ;;  %v457_v33 = vld [vmem:[#allocation8 + $0x10] sm:$0xff]  ;;  %v586_v44 = vld [vmem:[#allocation6 + $0x78] sm:$0xff]  ;;  %v584_v46 = vld [vmem:[#allocation6 + $0x68] sm:$0xff]  ;;  %vm809_vm4 = vcmp.lt.s32.totalorder %v1904_v11, 4  ;;  %s1263_s15 = sshll.u32 %s1766_s25, 8  ;;  %s2003_s10 = scalar_lea.vmem [#allocation9], %s1884_s13 }
  0x5d   : > { %1318 = vmatpush3.msra.mxu0 %v339_v4  ;;  %v321_v15 = vsel %vm317_vm0, 0.0, %v319_v14  ;;  %1333 = vmatpush3.msra.mxu1 %v458_v21  ;;  %v585_v45 = vld [vmem:[#allocation6 + $0x70] sm:$0xff]  ;;  %v583_v47 = vld [vmem:[#allocation6 + $0x60] sm:$0xff]  ;;  %v582_v48 = vld [vmem:[#allocation6 + $0x58] sm:$0xff]  ;;  %s1997_s8 = scalar_lea.hbm %s2095_s6, %s1263_s15  ;;  %vm1048_vm8 = vcmask 392192   ;;  %s1059_s11 = scalar_lea.sflag [#allocation11], %s1881_s12 }
  0x5e   : > { %1319 = vmatprep.subr.mxu0 %v338_v5  ;;  %1334 = vmatprep.subr.mxu1 %v457_v33  ;;  %v581_v49 = vld [vmem:[#allocation6 + $0x50] sm:$0xff]  ;;  %v580_v50 = vld [vmem:[#allocation6 + $0x48] sm:$0xff]  ;;  %v579_v51 = vld [vmem:[#allocation6 + $0x40] sm:$0xff]  ;;  %p2114_p2 = scmp.ne.s32.totalorder %s2106_s30, 0 }
  0x5f   : > { %1320 = vmatpush3.msra.mxu0 %v338_v5  ;;  %1335 = vmatpush3.msra.mxu1 %v457_v33  ;;  %v1231_v52 = vld [vmem:[%s2093_s4] ss:$0 sm:$0xff]  ;;  %v704_v4 = vld [vmem:[#allocation8 + $0x38] sm:$0xff]  ;;  %v1245_v11 = vld [vmem:[%s2091_s2 + $0x2] ss:$0 sm:$0xff] }
  0x60   : > { %1321 = vmatprep.subr.mxu0 %v337_v6  ;;  %1336 = vmatprep.subr.mxu1 %v456_v34  ;;  %v703_v5 = vld [vmem:[#allocation8 + $0x30] sm:$0xff] }
  0x61   : > { %1322 = vmatpush3.msra.mxu0 %v337_v6  ;;  %1337 = vmatpush3.msra.mxu1 %v456_v34  ;;  %v1235_v6 = vld [vmem:[%s2091_s2 + $0x1] ss:$0 sm:$0xff]  ;;  %v827_v34 = vld [vmem:[#allocation6 + $0x88] sm:$0xff] }
  0x62   : > { %1323 = vmatprep.subr.mxu0 %v336_v7  ;;  %1338 = vmatprep.subr.mxu1 %v455_v35  ;;  %v828_v33 = vld [vmem:[#allocation6 + $0x90] sm:$0xff] }
  0x63   : > { %1324 = vmatpush3.msra.mxu0 %v336_v7  ;;  %1339 = vmatpush3.msra.mxu1 %v455_v35  ;;  %v826_v35 = vld [vmem:[#allocation6 + $0x80] sm:$0xff] }
  0x64   : > { %1325 = vmatprep.subr.mxu0 %v335_v8  ;;  %1343 = vmatprep.subr.mxu1 %v586_v44 }
  0x65   : > { %1326 = vmatpush3.msra.mxu0 %v335_v8 }
  0x66   : > { %1327 = vmatprep.subr.mxu0 %v334_v9 }
  0x67   : > { %1328 = vmatpush3.msra.mxu0 %v334_v9 }
  0x68   : > { %1362 = vmatprep.subr.mxu0 %v704_v4 }
  0xca   : > { %v326_v16 = vpop.permute.xlu0 %325 }
  0xcb   : > { %v332_v17 = vsel %vm331_vm1, %v321_v15, %v326_v16 }
  0xcc   : > { %1329 = vmatprep.mubr.msk.f32.mxu0 %vm349_vm2, %v332_v17 }
  0xce   : > { %v328_v19 = vpop.permute.xlu0 %327 }
  0xcf   : > { %v333_v20 = vsel %vm331_vm1, %v318_v18, %v328_v19  ;;  %v702_v18 = vld [vmem:[#allocation8 + $0x28] sm:$0xff]  ;;  %v701_v19 = vld [vmem:[#allocation8 + $0x20] sm:$0xff] }
  0xd0   : > { %1330 = vmatmul.mubr.msk.f32.vlgmr.msra.gmra.mxu0 %vm349_vm2, %v333_v20 }
  0xd1   : > { %1363 = vmatpush3.msra.mxu0 %v704_v4 }
  0xd2   : > { %1364 = vmatprep.subr.mxu0 %v703_v5 }
  0xd3   : > { %1365 = vmatpush3.msra.mxu0 %v703_v5 }
  0xd4   : > { %1366 = vmatprep.subr.mxu0 %v702_v18 }
  0xd5   : > { %1367 = vmatpush3.msra.mxu0 %v702_v18 }
  0xd6   : > { %1368 = vmatprep.subr.mxu0 %v701_v19 }
  0xd7   : > { %1369 = vmatpush3.msra.mxu0 %v701_v19 }
 0x190   : > { %v1331_v23 = vpop.f32.mrf.mxu0 }
 0x191   : > { %v428_v24 = vadd.f32 %v1331_v23, %v1226_v22 }
 0x192   : > { %v422_v25 = vpop.f32.mrf.mxu0 }
 0x193   : > { %v1230_v26 = vmul.f32 -1.442695, %v428_v24  ;;  %v423_v27 = vadd.f32 %v1226_v22, %v422_v25 }
 0x195   : > { %v1229_v28 = vmul.f32 -1.442695, %v423_v27  ;;  %1482 = vpow2.f32 %v1230_v26 }
 0x197   : > { %1484 = vpow2.f32 %v1229_v28  ;;  %v833_v28 = vld [vmem:[#allocation6 + $0xb8] sm:$0xff] }
 0x198   : > { %1373 = vmatprep.subr.mxu0 %v833_v28 }
 0x1a2   : > { %v1483_v29 = vpop.eup %1482 }
 0x1a3   : > { %v440_v32 = vadd.f32 1.0, %v1483_v29  ;;  %v832_v29 = vld [vmem:[#allocation6 + $0xb0] sm:$0xff] }
 0x1a4   : > { %v1485_v30 = vpop.eup %1484 }
 0x1a5   : > { %v439_v31 = vadd.f32 1.0, %v1485_v30  ;;  %v831_v30 = vld [vmem:[#allocation6 + $0xa8] sm:$0xff] }
 0x1a7   : > { %1486 = vrcp.f32 %v439_v31  ;;  %v830_v31 = vld [vmem:[#allocation6 + $0xa0] sm:$0xff] }
 0x1a8   : > { %1488 = vrcp.f32 %v440_v32  ;;  %v829_v32 = vld [vmem:[#allocation6 + $0x98] sm:$0xff] }
 0x1a9   : > { %1490 = vtanh.f32 %v423_v27 }
 0x1aa   : > { %1492 = vtanh.f32 %v428_v24 }
 0x1b4   : > { %v1487_v36 = vpop.eup %1486 }
 0x1b5   : > { %447 = vrot.lane.b32.xlu1 %v1487_v36, %s1704_s17  ;;  %v1489_v37 = vpop.eup %1488  ;;  %v1241_v36 = vld [vmem:[%s2093_s4 + $0x1] ss:$0 sm:$0xff] }
 0x1b6   : > { %v1491_v38 = vpop.eup %1490 }
 0x1b7   : > { %v1493_v41 = vpop.eup %1492 }
 0x1b9   : > { %449 = vrot.lane.b32.xlu1 %v1489_v37, %s1704_s17 }
 0x227   : > { %v448_v39 = vpop.permute.xlu1 %447 }
 0x228   : > { %v453_v40 = vmul.f32 %v1491_v38, %v448_v39 }
 0x22a   : > { %1340 = vmatprep.mubr.msk.f32.mxu1 %vm331_vm1, %v453_v40 }
 0x22b   : > { %v450_v42 = vpop.permute.xlu1 %449 }
 0x22c   : > { %v454_v43 = vmul.f32 %v1493_v41, %v450_v42 }
 0x22e   : > { %1341 = vmatmul.mubr.msk.f32.vlgmr.msra.gmra.mxu1 %vm331_vm1, %v454_v43 }
 0x22f   : > { %1344 = vmatpush3.msra.mxu1 %v586_v44 }
 0x230   : > { %1345 = vmatprep.subr.mxu1 %v585_v45 }
 0x231   : > { %1346 = vmatpush3.msra.mxu1 %v585_v45 }
 0x232   : > { %1347 = vmatprep.subr.mxu1 %v584_v46 }
 0x233   : > { %1348 = vmatpush3.msra.mxu1 %v584_v46 }
 0x234   : > { %1349 = vmatprep.subr.mxu1 %v583_v47 }
 0x235   : > { %1350 = vmatpush3.msra.mxu1 %v583_v47 }
 0x236   : > { %1351 = vmatprep.subr.mxu1 %v582_v48 }
 0x237   : > { %1352 = vmatpush3.msra.mxu1 %v582_v48 }
 0x238   : > { %1353 = vmatprep.subr.mxu1 %v581_v49 }
 0x239   : > { %1354 = vmatpush3.msra.mxu1 %v581_v49 }
 0x23a   : > { %1355 = vmatprep.subr.mxu1 %v580_v50 }
 0x23b   : > { %1356 = vmatpush3.msra.mxu1 %v580_v50 }
 0x23c   : > { %1357 = vmatprep.subr.mxu1 %v579_v51 }
 0x23d   : > { %1358 = vmatpush3.msra.mxu1 %v579_v51 }
 0x2ee   : > { %v1342_v53 = vpop.f32.mrf.mxu1 }
 0x2ef   : > { %v1923_v54 = vadd.f32 %v1342_v53, %v1231_v52  ;;  %v950_v53 = vld [vmem:[#allocation8 + $0x50] sm:$0xff] }
 0x2f0   : > { %v538_v55 = vpop.f32.mrf.mxu1 }
 0x2f1   : > { %v1927_v56 = vadd.f32 %v1923_v54, %v1900_v3  ;;  %v1929_v57 = vadd.f32 %v1231_v52, %v538_v55  ;;  %v951_v52 = vld [vmem:[#allocation8 + $0x58] sm:$0xff] }
 0x2f2   : > { %1392 = vmatprep.subr.mxu1 %v951_v52 }
 0x2f3   : > { %v1933_v58 = vadd.f32 %v1929_v57, %v1896_v0  ;;  %572 = vrot.lane.b32.xlu1 %v1927_v56, %s1703_s29  ;;  %v561_v60 = vrot.slane %v1927_v56, 6 }
 0x2f5   : > { %570 = vrot.lane.b32.xlu0 %v1933_v58, %s1703_s29  ;;  %v560_v59 = vrot.slane %v1933_v58, 6 }
 0x2f7   : > { %v564_v61 = vsel %vm562_vm3, %v561_v60, %v560_v59  ;;  %v563_v2 = vsel %vm562_vm3, %v560_v59, %v561_v60 }
 0x2f8   : > { %v566_v1 = vsel %vm562_vm3, 0.0, %v564_v61 }
 0x365   : > { %v573_v62 = vpop.permute.xlu1 %572 }
 0x366   : > { %v577_v3 = vsel %vm331_vm1, %v563_v2, %v573_v62 }
 0x367   : > { %v571_v63 = vpop.permute.xlu0 %570 }
 0x368   : > { %v576_v0 = vsel %vm331_vm1, %v566_v1, %v571_v63 }
 0x369   : > { %1359 = vmatprep.mubr.msk.f32.mxu1 %vm349_vm2, %v576_v0  ;;  %v949_v0 = vld [vmem:[#allocation8 + $0x48] sm:$0xff] }
 0x36a   : > { %1360 = vmatmul.mubr.msk.f32.vlgmr.msra.gmra.mxu1 %vm349_vm2, %v577_v3  ;;  %v948_v3 = vld [vmem:[#allocation8 + $0x40] sm:$0xff] }
 0x36b   : > { %1393 = vmatpush3.msra.mxu1 %v951_v52 }
 0x36c   : > { %1394 = vmatprep.subr.mxu1 %v950_v53 }
 0x36d   : > { %1395 = vmatpush3.msra.mxu1 %v950_v53 }
 0x36e   : > { %1396 = vmatprep.subr.mxu1 %v949_v0 }
 0x36f   : > { %1397 = vmatpush3.msra.mxu1 %v949_v0 }
 0x370   : > { %1398 = vmatprep.subr.mxu1 %v948_v3 }
 0x371   : > { %1399 = vmatpush3.msra.mxu1 %v948_v3 }
 0x42a   : > { %v1361_v7 = vpop.f32.mrf.mxu1 }
 0x42b   : > { %v673_v8 = vadd.f32 %v1361_v7, %v1235_v6 }
 0x42c   : > { %v667_v9 = vpop.f32.mrf.mxu1 }
 0x42d   : > { %v1239_v10 = vmul.f32 -1.442695, %v673_v8  ;;  %v668_v12 = vadd.f32 %v1235_v6, %v667_v9 }
 0x42f   : > { %1494 = vpow2.f32 %v1239_v10  ;;  %v1238_v13 = vmul.f32 -1.442695, %v668_v12 }
 0x431   : > { %1496 = vpow2.f32 %v1238_v13 }
 0x43c   : > { %v1495_v14 = vpop.eup %1494 }
 0x43d   : > { %v685_v15 = vadd.f32 1.0, %v1495_v14 }
 0x43e   : > { %v1497_v16 = vpop.eup %1496 }
 0x43f   : > { %1498 = vrcp.f32 %v685_v15  ;;  %v684_v17 = vadd.f32 1.0, %v1497_v16  ;;  %v1251_v15 = vld [vmem:[%s2093_s4 + $0x2] ss:$0 sm:$0xff] }
 0x441   : > { %1500 = vrcp.f32 %v684_v17 }
 0x442   : > { %1502 = vtanh.f32 %v668_v12 }
 0x443   : > { %1504 = vtanh.f32 %v673_v8 }
 0x44c   : > { %v1499_v20 = vpop.eup %1498 }
 0x44d   : > { %694 = vrot.lane.b32.xlu1 %v1499_v20, %s1704_s17 }
 0x44e   : > { %v1501_v21 = vpop.eup %1500 }
 0x44f   : > { %692 = vrot.lane.b32.xlu0 %v1501_v21, %s1704_s17  ;;  %v1503_v23 = vpop.eup %1502 }
 0x450   : > { %v1505_v25 = vpop.eup %1504 }
 0x4bf   : > { %v695_v22 = vpop.permute.xlu1 %694 }
 0x4c0   : > { %v699_v27 = vmul.f32 %v1505_v25, %v695_v22 }
 0x4c1   : > { %v693_v24 = vpop.permute.xlu0 %692 }
 0x4c2   : > { %v698_v26 = vmul.f32 %v1503_v23, %v693_v24 }
 0x4c4   : > { %1370 = vmatprep.mubr.msk.f32.mxu0 %vm331_vm1, %v698_v26 }
 0x4c5   : > { %1371 = vmatmul.mubr.msk.f32.vlgmr.msra.gmra.mxu0 %vm331_vm1, %v699_v27 }
 0x4c6   : > { %1374 = vmatpush3.msra.mxu0 %v833_v28 }
 0x4c7   : > { %1375 = vmatprep.subr.mxu0 %v832_v29 }
 0x4c8   : > { %1376 = vmatpush3.msra.mxu0 %v832_v29 }
 0x4c9   : > { %1377 = vmatprep.subr.mxu0 %v831_v30 }
 0x4ca   : > { %1378 = vmatpush3.msra.mxu0 %v831_v30 }
 0x4cb   : > { %1379 = vmatprep.subr.mxu0 %v830_v31 }
 0x4cc   : > { %1380 = vmatpush3.msra.mxu0 %v830_v31 }
 0x4cd   : > { %1381 = vmatprep.subr.mxu0 %v829_v32 }
 0x4ce   : > { %1382 = vmatpush3.msra.mxu0 %v829_v32 }
 0x4cf   : > { %1383 = vmatprep.subr.mxu0 %v828_v33 }
 0x4d0   : > { %1384 = vmatpush3.msra.mxu0 %v828_v33 }
 0x4d1   : > { %1385 = vmatprep.subr.mxu0 %v827_v34 }
 0x4d2   : > { %1386 = vmatpush3.msra.mxu0 %v827_v34 }
 0x4d3   : > { %1387 = vmatprep.subr.mxu0 %v826_v35 }
 0x4d4   : > { %1388 = vmatpush3.msra.mxu0 %v826_v35 }
 0x585   : > { %v1372_v37 = vpop.f32.mrf.mxu0 }
 0x586   : > { %v791_v38 = vadd.f32 %v1372_v37, %v1241_v36 }
 0x587   : > { %v785_v39 = vpop.f32.mrf.mxu0 }
 0x588   : > { %v1957_v40 = vadd.f32 %v791_v38, %v1927_v56  ;;  %v786_v41 = vadd.f32 %v1241_v36, %v785_v39 }
 0x58a   : > { %v1960_v42 = vadd.f32 %v786_v41, %v1933_v58  ;;  %819 = vrot.lane.b32.xlu1 %v1957_v40, %s1703_s29  ;;  %v808_v44 = vrot.slane %v1957_v40, 4 }
 0x58c   : > { %817 = vrot.lane.b32.xlu0 %v1960_v42, %s1703_s29  ;;  %v807_v43 = vrot.slane %v1960_v42, 4 }
 0x58e   : > { %v811_v45 = vsel %vm809_vm4, %v808_v44, %v807_v43  ;;  %v810_v49 = vsel %vm809_vm4, %v807_v43, %v808_v44 }
 0x58f   : > { %v813_v48 = vsel %vm809_vm4, 0.0, %v811_v45 }
 0x5fc   : > { %v820_v46 = vpop.permute.xlu1 %819 }
 0x5fd   : > { %v824_v51 = vsel %vm331_vm1, %v810_v49, %v820_v46 }
 0x5fe   : > { %v818_v47 = vpop.permute.xlu0 %817 }
 0x5ff   : > { %v823_v50 = vsel %vm331_vm1, %v813_v48, %v818_v47 }
 0x600   : > { %1389 = vmatprep.mubr.msk.f32.mxu0 %vm349_vm2, %v823_v50 }
 0x601   : > { %1390 = vmatmul.mubr.msk.f32.vlgmr.msra.gmra.mxu0 %vm349_vm2, %v824_v51 }
 0x6c1   : > { %v1391_v55 = vpop.f32.mrf.mxu0 }
 0x6c2   : > { %v920_v56 = vadd.f32 %v1391_v55, %v1245_v11 }
 0x6c3   : > { %v914_v58 = vpop.f32.mrf.mxu0 }
 0x6c4   : > { %v1249_v59 = vmul.f32 -1.442695, %v920_v56  ;;  %v915_v60 = vadd.f32 %v1245_v11, %v914_v58 }
 0x6c6   : > { %1506 = vpow2.f32 %v1249_v59  ;;  %v1248_v61 = vmul.f32 -1.442695, %v915_v60 }
 0x6c8   : > { %1508 = vpow2.f32 %v1248_v61 }
 0x6d3   : > { %v1507_v62 = vpop.eup %1506 }
 0x6d4   : > { %v932_v63 = vadd.f32 1.0, %v1507_v62 }
 0x6d5   : > { %v1509_v1 = vpop.eup %1508 }
 0x6d6   : > { %1510 = vrcp.f32 %v932_v63  ;;  %v931_v2 = vadd.f32 1.0, %v1509_v1 }
 0x6d8   : > { %1512 = vrcp.f32 %v931_v2 }
 0x6d9   : > { %1514 = vtanh.f32 %v915_v60 }
 0x6da   : > { %1516 = vtanh.f32 %v920_v56 }
 0x6e3   : > { %v1511_v4 = vpop.eup %1510 }
 0x6e4   : > { %941 = vrot.lane.b32.xlu1 %v1511_v4, %s1704_s17 }
 0x6e5   : > { %v1513_v5 = vpop.eup %1512 }
 0x6e6   : > { %939 = vrot.lane.b32.xlu0 %v1513_v5, %s1704_s17  ;;  %v1515_v7 = vpop.eup %1514 }
 0x6e7   : > { %v1517_v9 = vpop.eup %1516 }
 0x6e8   : > { %551 = vrot.lane.b32.xlu1 %v1923_v54, %s1704_s17 }
 0x6ea   : > { %549 = vrot.lane.b32.xlu0 %v1929_v57, %s1704_s17  ;;  %s309_s17 = scalar_lea.vmem [#allocation10], %s1884_s13 }
 0x6eb   : > { %s1088_s20 = sshll.u32 %s309_s17, 4  ;;  %s1999_s20 = int_to_ptr.vmem [resolvable:$true] %s1088_s20 }
 0x6ec   : > { %798 = vrot.lane.b32.xlu1 %v791_v38, %s1705_s9  ;;  %s1598_s18 = scalar_lea.vmem %s1999_s20, 256 }
 0x6ed   : > { %p1599_p5 = scmp.ne.s32.totalorder %s1999_s20, %s1598_s18 }
 0x6ee   : > { %796 = vrot.lane.b32.xlu0 %v786_v41, %s1705_s9  ;;  %s1706_s9 = smov [#allocation10]  }
 0x6ef   : > { %p1600_p7 = pnand %p1599_p5, %p2114_p2  ;;  %s1602_s29 = sshll.u32 %s1706_s9, 4  ;;  %s1603_s29 = int_to_ptr.vmem [resolvable:$false] %s1602_s29 }
 0x6f0   : > { %s1604_s27 = scalar_lea.vmem %s1603_s29, 512  ;;  %p1605_p13 = scmp.lt.s32.totalorder %s1999_s20, %s1603_s29 }
 0x6f1   : > { %p1601_p12 = pneg %p1600_p7  ;;  %p1606_p0 = scmp.lt.s32.totalorder %s1604_s27, %s1598_s18 }
 0x6f3   : > { %p1607_p10 = por %p1606_p0, %p1605_p13 }
 0x6f5   : > { %p1608_p3 = pnand %p1607_p10, %p1601_p12 }
 0x756   : > { %v942_v6 = vpop.permute.xlu1 %941 }
 0x757   : > { %v946_v12 = vmul.f32 %v1517_v9, %v942_v6 }
 0x758   : > { %v940_v8 = vpop.permute.xlu0 %939 }
 0x759   : > { %v945_v10 = vmul.f32 %v1515_v7, %v940_v8 }
 0x75a   : > { %v552_v13 = vpop.permute.xlu1 %551 }
 0x75b   : > { %557 = vst.msk [vmem:[#allocation2 + $0x8] sm:$0xff] %vm555_vm5, %v552_v13  ;;  %1400 = vmatprep.mubr.msk.f32.mxu1 %vm331_vm1, %v945_v10 }
 0x75c   : > { %v550_v54 = vpop.permute.xlu0 %549  ;;  %1401 = vmatmul.mubr.msk.f32.vlgmr.msra.gmra.mxu1 %vm331_vm1, %v946_v12 }
 0x75d   : > { %556 = vst.msk [vmem:[#allocation2] sm:$0xff] %vm555_vm5, %v550_v54 }
 0x75e   : > { %v799_v57 = vpop.permute.xlu1 %798 }
 0x75f   : > { %804 = vst.msk [vmem:[#allocation2 + $0x8] sm:$0xff] %vm802_vm6, %v799_v57 }
 0x760   : > { %v797_v14 = vpop.permute.xlu0 %796 }
 0x761   : > { %803 = vst.msk [vmem:[#allocation2] sm:$0xff] %vm802_vm6, %v797_v14 }
 0x81c   : > { %v1402_v16 = vpop.f32.mrf.mxu1 }
 0x81d   : > { %v1038_v17 = vadd.f32 %v1402_v16, %v1251_v15 }
 0x81e   : > { %v1032_v18 = vpop.f32.mrf.mxu1 }
 0x81f   : > { %1043 = vst.msk [vmem:[#allocation2 + $0x8] sm:$0xff] %vm1041_vm7, %v1038_v17  ;;  %v1045_v19 = vadd.f32 %v1038_v17, %v1957_v40  ;;  %v1033_v20 = vadd.f32 %v1251_v15, %v1032_v18 }
 0x821   : > { %1052 = vst.msk [vmem:[%s309_s17 + $0x8] sm:$0xff] %vm331_vm1, %v1045_v19  ;;  %v1044_v21 = vadd.f32 %v1033_v20, %v1960_v42 }
 0x822   : > { %1042 = vst.msk [vmem:[#allocation2] sm:$0xff] %vm1041_vm7, %v1033_v20 }
 0x823   : > { %1051 = vst.msk [vmem:[%s309_s17] sm:$0xff] %vm331_vm1, %v1044_v21 }
 0x824   : > { %1611 = shalt.err (!%p1608_p3)
}
 0x825   : > { %s1612_s13 = scalar_lea.hbm %s1997_s8, 256  ;;  %s1616_s16 = scalar_lea.hbm %s2095_s6, 512 }
 0x826   : > { %p1613_p11 = scmp.ne.s32.totalorder %s1997_s8, %s1612_s13  ;;  %p1617_p4 = scmp.lt.s32.totalorder %s1997_s8, %s2095_s6 }
 0x827   : > { %p1618_p6 = scmp.lt.s32.totalorder %s1616_s16, %s1612_s13 }
 0x828   : > { %p1614_p9 = pnand %p1613_p11, %p2114_p2 }
 0x829   : > { %p1619_p8 = por %p1618_p6, %p1617_p4 }
 0x82a   : > { %p1615_p1 = pneg %p1614_p9 }
 0x82c   : > { %p1620_p5 = pnand %p1619_p8, %p1615_p1 }
 0x82e   : > { %1623 = shalt.err (!%p1620_p5)
}
 0x82f   : > { %s1707_s18 = smov 128   ;;  %s1708_s29 = smov 8   ;;  %v1047_v22 = vld [vmem:[#allocation2 + $0x8] sm:$0xff]  ;;  %v1046_v23 = vld [vmem:[#allocation2] sm:$0xff] }
 0x830   : > { %1414 = dma.vmem_to_hbm [thread:$0]  (%p2114_p2), %s1999_s20, 256, %s1997_s8, %s1059_s11, %s1707_s18, %s1707_s18, %s1708_s29  }
 0x831   : > { %1050 = vst.msk [vmem:[%s2003_s10 + $0x8] sm:$0xff] %vm1048_vm8, %v1047_v22  ;;  %s2039_s13 = scalar_lea.hbm %s2094_s5, %s1263_s15  ;;  %s2115_s17 = sshll.u32 %s2003_s10, 4  ;;  %1049 = vst.msk [vmem:[%s2003_s10] sm:$0xff] %vm1048_vm8, %v1046_v23  ;;  %s2043_s17 = int_to_ptr.vmem [resolvable:$true] %s2115_s17 }
 0x832   : > { %s1054_s14 = scalar_lea.sflag [#allocation5], %s1881_s12  ;;  %s1624_s20 = scalar_lea.vmem %s2043_s17, 256 }
 0x833   : > { %p1625_p7 = scmp.ne.s32.totalorder %s2043_s17, %s1624_s20  ;;  %s1709_s25 = smov [#allocation9]  }
 0x834   : > { %s1628_s8 = sshll.u32 %s1709_s25, 4  ;;  %s1629_s8 = int_to_ptr.vmem [resolvable:$false] %s1628_s8 }
 0x835   : > { %p1626_p12 = pnand %p1625_p7, %p2114_p2  ;;  %s1630_s15 = scalar_lea.vmem %s1629_s8, 512 }
 0x836   : > { %p1631_p0 = scmp.lt.s32.totalorder %s2043_s17, %s1629_s8  ;;  %p1632_p10 = scmp.lt.s32.totalorder %s1630_s15, %s1624_s20 }
 0x837   : > { %p1627_p13 = pneg %p1626_p12 }
 0x838   : > { %p1633_p3 = por %p1632_p10, %p1631_p0 }
 0x83a   : > { %p1634_p11 = pnand %p1633_p3, %p1627_p13 }
 0x83c   : > { %1637 = shalt.err (!%p1634_p11)
}
 0x83d   : > { %s1638_s10 = scalar_lea.hbm %s2039_s13, 256  ;;  %s1642_s16 = scalar_lea.hbm %s2094_s5, 512 }
 0x83e   : > { %p1639_p9 = scmp.ne.s32.totalorder %s2039_s13, %s1638_s10  ;;  %p1643_p6 = scmp.lt.s32.totalorder %s2039_s13, %s2094_s5 }
 0x83f   : > { %p1644_p8 = scmp.lt.s32.totalorder %s1642_s16, %s1638_s10 }
 0x840   : > { %p1640_p1 = pnand %p1639_p9, %p2114_p2 }
 0x841   : > { %p1645_p5 = por %p1644_p8, %p1643_p6 }
 0x842   : > { %p1641_p4 = pneg %p1640_p1 }
 0x844   : > { %p1646_p7 = pnand %p1645_p5, %p1641_p4 }
 0x846   : > { %1649 = shalt.err (!%p1646_p7)
}
 0x847   : > { %1413 = dma.vmem_to_hbm [thread:$0]  (%p2114_p2), %s2043_s17, 256, %s2039_s13, %s1054_s14, %s1707_s18, %s1707_s18, %s1708_s29  }
 0x848 PF: > { %s1103_s27 = sand.u32 1, %s1684_s21   ;;  %p2116_p12 = scmp.ne.s32.totalorder %s2103_s28, 0 }
 0x849   : > { %p2117_p13 = scmp.ge.s32.totalorder %s1696_s24, 2  ;;  %s1104_s20 = scalar_lea.sflag [#allocation5], %s1103_s27 }
 0x84b   : > { %p1429_p0 = pnand %p2117_p13, %p2116_p12 }
 0x84d   : > { %p1430_p10 = pneg %p1429_p0 }
 0x84f   : > { %1675 = dma.done.wait (%p1430_p10), %s1104_s20, 256  }
 0x850   : > { %1677 = vsyncadd (%p1430_p10), %s1104_s20, 4294967040  ;;  %s1113_s25 = scalar_lea.sflag [#allocation11], %s1103_s27 }
 0x851   : > { %1679 = dma.done.wait (%p1430_p10), %s1113_s25, 256  }
 0x852   : > { %1681 = vsyncadd (%p1430_p10), %s1113_s25, 4294967040  ;;  %p24_p2 = scmp.ge.s32.totalorder %s1823_s19, 4   ;;  %s2118_s21 = smov %s1688_s22 }
 0x853   : > { %s2119_s22 = smov %s1692_s23  ;;  %s2120_s23 = smov %s1839_s7 }
 0x854   : > { %s2121_s24 = smov %s1823_s19  ;;  %26 = sbr.rel (!%p24_p2) target bundleno = 8 (0x8), region = 118 }
 0x859   :  { %1118 = vsyncpa [#allocation4], 1 }
 0x85a   :  { %1120 = vsyncpa [#allocation4 + $0x1], 1 }
 0x85b   :  { %1121 = vsyncpa [#allocation7], 1 }
 0x85c   :  { %1122 = vsyncpa [#allocation5], 1 }
 0x85d   :  { %1124 = vsyncpa [#allocation5 + $0x1], 1 }
 0x85e   :  { %1125 = vsyncpa [#allocation11], 1 }
 0x85f   :  { %1127 = vsyncpa [#allocation11 + $0x1], 1 }

</bundles_post_ra>
